<compile_context>
chip_gen: v7x
topology: tpu7x:2x2x1
jax: 0.10.0
libtpu: 0.0.40
codegen_flags: <defaults>
</compile_context>

<pallas_src>
import functools

import jax
import jax.numpy as jnp
from jax import lax
from jax.experimental import pallas as pl
from jax.experimental.pallas import tpu as pltpu


def _round_up(x, m):
    return ((x + m - 1) // m) * m


def _embed_gather_kernel(ids_ref, table_hbm, out_ref, buf, sems):
    """Gather one tile of embedding rows from HBM into the current output tile.

    ids_ref  : SMEM (N_pad,) int32     -- scalar-prefetched token ids
    table_hbm: HBM  (V, Dp)            -- full embedding table (memory_space=pl.ANY)
    out_ref  : VMEM (tile_n, Dp)       -- output tile
    buf      : VMEM (tile_n, Dp)       -- gather staging buffer
    sems     : DMA semaphores (nsem,)  -- round-robin pool of in-flight row DMAs
    """
    tile_n, _ = out_ref.shape
    nsem = sems.shape[0]
    base = pl.program_id(0) * tile_n

    def _row_wait(slot):
        # Waits for one row-sized DMA on semaphore `slot`; src/dst views only fix
        # the expected byte count, so placeholder rows are fine.
        pltpu.make_async_copy(table_hbm.at[0], buf.at[0], sems.at[slot]).wait()

    def issue(r, carry):
        slot = r % nsem

        @pl.when(r >= nsem)
        def _():
            _row_wait(slot)  # free the slot that was issued `nsem` rows ago

        tok = ids_ref[base + r]
        pltpu.make_async_copy(table_hbm.at[tok], buf.at[r], sems.at[slot]).start()
        return carry

    lax.fori_loop(0, tile_n, issue, 0)

    # Drain the remaining in-flight DMAs (each of these slots has exactly one
    # pending transfer at this point).
    for slot in range(min(tile_n, nsem)):
        _row_wait(slot)

    out_ref[...] = buf[...]


@functools.partial(jax.jit, static_argnames=("tile_n", "max_inflight"))
def embedder_forward(tokens, table, *, tile_n=256, max_inflight=16):
    """Pallas equivalent of Embedder.forward: table[tokens.int()]."""
    B, S = tokens.shape
    V, D = table.shape
    N = B * S

    # Lane-dense output: pad the model dim up to a multiple of 128 (no-op when
    # D is already a multiple of 128, the common real-model case).
    Dp = _round_up(D, 128)
    if Dp != D:
        table = jnp.pad(table, ((0, 0), (0, Dp - D)))

    # Tile the flattened token stream; pad the ragged tail.
    tile_n = _round_up(min(tile_n, max(N, 8)), 8)
    N_pad = _round_up(N, tile_n)

    ids = tokens.astype(jnp.int32).reshape(-1)
    # TODO(synk): nn.Embedding raises on out-of-range ids; we clamp so every row
    # DMA address is valid instead of faulting.
    ids = jnp.clip(ids, 0, V - 1)
    if N_pad != N:
        ids = jnp.pad(ids, (0, N_pad - N))

    nsem = max(1, min(max_inflight, tile_n))

    out = pl.pallas_call(
        _embed_gather_kernel,
        out_shape=jax.ShapeDtypeStruct((N_pad, Dp), table.dtype),
        grid_spec=pltpu.PrefetchScalarGridSpec(
            num_scalar_prefetch=1,                          # ids -> SMEM
            grid=(N_pad // tile_n,),
            in_specs=[pl.BlockSpec(memory_space=pl.ANY)],   # table stays in HBM
            out_specs=pl.BlockSpec((tile_n, Dp), lambda i, ids: (i, 0)),
            scratch_shapes=[
                pltpu.VMEM((tile_n, Dp), table.dtype),      # gather staging tile
                pltpu.SemaphoreType.DMA((nsem,)),           # in-flight DMA pool
            ],
        ),
        compiler_params=pltpu.CompilerParams(
            dimension_semantics=("parallel",),
        ),
    )(ids, table)

    return out[:N, :D].reshape(B, S, D)


if __name__ == "__main__":
    # Small shapes consistent with the module: batch=2, seq=8, vocab=32, d_model=32.
    B, S = 2, 8
    vocab_size, d_model = 32, 32

    key = jax.random.PRNGKey(0)
    k_tok, k_emb = jax.random.split(key)

    tokens = jax.random.randint(k_tok, (B, S), 0, vocab_size, dtype=jnp.int32)
    # nn.Embedding default init: weight ~ N(0, 1)
    embed_table = jax.random.normal(k_emb, (vocab_size, d_model), dtype=jnp.float32)

    out = embedder_forward(tokens, embed_table)
    out = jax.block_until_ready(out)

    # Reference check: plain JAX gather.
    ref = embed_table[tokens]
    assert out.shape == (B, S, d_model)
    assert out.dtype == jnp.float32
    assert jnp.allclose(out, ref, atol=1e-6), "mismatch vs reference gather"

    print("KERNEL_OK")
</pallas_src>

<mosaic_0001>
module attributes {stable_mosaic.version = 11 : i64} {
  func.func @_embed_gather_kernel(%arg0: i32, %arg1: memref<16xi32, #tpu.memory_space<smem>>, %arg2: memref<32x128xf32, #tpu.memory_space<any>>, %arg3: memref<16x128xf32, #tpu.memory_space<vmem>>, %arg4: memref<16x128xf32, #tpu.memory_space<vmem>>, %arg5: memref<16x!tpu.dma_semaphore, #tpu.memory_space<semaphore_mem>>) attributes {dimension_semantics = [#tpu.dimension_semantics<parallel>], iteration_bounds = array<i64: 1>, scalar_prefetch = 1 : i64, scratch_operands = 2 : i64, tpu.core_type = #tpu.core_type<tc>, window_params = [{}, {transform_indices = @transform_1, window_bounds = array<i64: 16, 128>}]} {
    %c16_i32 = arith.constant 16 : i32
    %0 = arith.muli %arg0, %c16_i32 : i32
    %c0_i32 = arith.constant 0 : i32
    %c16_i32_0 = arith.constant 16 : i32
    %1 = arith.addi %c0_i32, %c16_i32_0 : i32
    %c1_i32 = arith.constant 1 : i32
    scf.for %arg6 = %c0_i32 to %1 step %c1_i32  : i32 {
      %c16_i32_71 = arith.constant 16 : i32
      %c0_i32_72 = arith.constant 0 : i32
      %100 = arith.cmpi eq, %c16_i32_71, %c0_i32_72 : i32
      %c1_i32_73 = arith.constant 1 : i32
      %101 = arith.select %100, %c1_i32_73, %c16_i32_71 : i32
      %102 = arith.remsi %arg6, %101 : i32
      %c0_i32_74 = arith.constant 0 : i32
      %103 = arith.cmpi ne, %102, %c0_i32_74 : i32
      %c0_i32_75 = arith.constant 0 : i32
      %104 = arith.cmpi slt, %102, %c0_i32_75 : i32
      %c0_i32_76 = arith.constant 0 : i32
      %105 = arith.cmpi slt, %101, %c0_i32_76 : i32
      %106 = arith.xori %104, %105 : i1
      %107 = arith.andi %106, %103 : i1
      %108 = arith.addi %102, %101 : i32
      %109 = arith.select %107, %108, %102 : i32
      %c16_i32_77 = arith.constant 16 : i32
      %110 = arith.cmpi sge, %arg6, %c16_i32_77 : i32
      %111 = arith.extui %110 : i1 to i32
      %c0_i32_78 = arith.constant 0 : i32
      %112 = arith.cmpi ne, %111, %c0_i32_78 : i32
      scf.if %112 {
        %c0_i32_81 = arith.constant 0 : i32
        %c0_i32_82 = arith.constant 0 : i32
        %c0_i32_83 = arith.constant 0 : i32
        %122 = tpu.memref_slice %arg2[%c0_i32_81, %c0_i32_83] : memref<32x128xf32, #tpu.memory_space<any>> -> memref<1x128xf32, #tpu.memory_space<any>>
        %123 = tpu.memref_squeeze %122 : memref<1x128xf32, #tpu.memory_space<any>> -> memref<128xf32, #tpu.memory_space<any>>
        %c0_i32_84 = arith.constant 0 : i32
        %124 = tpu.memref_slice %arg4[%c0_i32_82, %c0_i32_84] : memref<16x128xf32, #tpu.memory_space<vmem>> -> memref<1x128xf32, #tpu.memory_space<vmem>>
        %125 = tpu.memref_squeeze %124 : memref<1x128xf32, #tpu.memory_space<vmem>> -> memref<128xf32, #tpu.memory_space<vmem>>
        %126 = tpu.memref_slice %arg5[%109] : memref<16x!tpu.dma_semaphore, #tpu.memory_space<semaphore_mem>> -> memref<1x!tpu.dma_semaphore, #tpu.memory_space<semaphore_mem>>
        %127 = tpu.memref_squeeze %126 : memref<1x!tpu.dma_semaphore, #tpu.memory_space<semaphore_mem>> -> memref<!tpu.dma_semaphore, #tpu.memory_space<semaphore_mem>>
        tpu.wait_dma2 semaphore(%127 : memref<!tpu.dma_semaphore, #tpu.memory_space<semaphore_mem>>) src(%123 : memref<128xf32, #tpu.memory_space<any>>) dst(%125 : memref<128xf32, #tpu.memory_space<vmem>>)
      } else {
      }
      %113 = arith.addi %0, %arg6 : i32
      %114 = arith.index_cast %113 : i32 to index
      %115 = memref.load %arg1[%114] : memref<16xi32, #tpu.memory_space<smem>>
      %c0_i32_79 = arith.constant 0 : i32
      %116 = tpu.memref_slice %arg2[%115, %c0_i32_79] : memref<32x128xf32, #tpu.memory_space<any>> -> memref<1x128xf32, #tpu.memory_space<any>>
      %117 = tpu.memref_squeeze %116 : memref<1x128xf32, #tpu.memory_space<any>> -> memref<128xf32, #tpu.memory_space<any>>
      %c0_i32_80 = arith.constant 0 : i32
      %118 = tpu.memref_slice %arg4[%arg6, %c0_i32_80] : memref<16x128xf32, #tpu.memory_space<vmem>> -> memref<1x128xf32, #tpu.memory_space<vmem>>
      %119 = tpu.memref_squeeze %118 : memref<1x128xf32, #tpu.memory_space<vmem>> -> memref<128xf32, #tpu.memory_space<vmem>>
      %120 = tpu.memref_slice %arg5[%109] : memref<16x!tpu.dma_semaphore, #tpu.memory_space<semaphore_mem>> -> memref<1x!tpu.dma_semaphore, #tpu.memory_space<semaphore_mem>>
      %121 = tpu.memref_squeeze %120 : memref<1x!tpu.dma_semaphore, #tpu.memory_space<semaphore_mem>> -> memref<!tpu.dma_semaphore, #tpu.memory_space<semaphore_mem>>
      tpu.enqueue_dma source(%117 : memref<128xf32, #tpu.memory_space<any>>) target(%119 : memref<128xf32, #tpu.memory_space<vmem>>) target_semaphore(%121 : memref<!tpu.dma_semaphore, #tpu.memory_space<semaphore_mem>>)
    }
    %c16_i32_1 = arith.constant 16 : i32
    %c0_i32_2 = arith.constant 0 : i32
    %c0_i32_3 = arith.constant 0 : i32
    %c0_i32_4 = arith.constant 0 : i32
    %c0_i32_5 = arith.constant 0 : i32
    %2 = tpu.memref_slice %arg2[%c0_i32_2, %c0_i32_5] : memref<32x128xf32, #tpu.memory_space<any>> -> memref<1x128xf32, #tpu.memory_space<any>>
    %3 = tpu.memref_squeeze %2 : memref<1x128xf32, #tpu.memory_space<any>> -> memref<128xf32, #tpu.memory_space<any>>
    %c0_i32_6 = arith.constant 0 : i32
    %4 = tpu.memref_slice %arg4[%c0_i32_3, %c0_i32_6] : memref<16x128xf32, #tpu.memory_space<vmem>> -> memref<1x128xf32, #tpu.memory_space<vmem>>
    %5 = tpu.memref_squeeze %4 : memref<1x128xf32, #tpu.memory_space<vmem>> -> memref<128xf32, #tpu.memory_space<vmem>>
    %6 = tpu.memref_slice %arg5[%c0_i32_4] : memref<16x!tpu.dma_semaphore, #tpu.memory_space<semaphore_mem>> -> memref<1x!tpu.dma_semaphore, #tpu.memory_space<semaphore_mem>>
    %7 = tpu.memref_squeeze %6 : memref<1x!tpu.dma_semaphore, #tpu.memory_space<semaphore_mem>> -> memref<!tpu.dma_semaphore, #tpu.memory_space<semaphore_mem>>
    tpu.wait_dma2 semaphore(%7 : memref<!tpu.dma_semaphore, #tpu.memory_space<semaphore_mem>>) src(%3 : memref<128xf32, #tpu.memory_space<any>>) dst(%5 : memref<128xf32, #tpu.memory_space<vmem>>)
    %c0_i32_7 = arith.constant 0 : i32
    %c0_i32_8 = arith.constant 0 : i32
    %c1_i32_9 = arith.constant 1 : i32
    %c0_i32_10 = arith.constant 0 : i32
    %8 = tpu.memref_slice %arg2[%c0_i32_7, %c0_i32_10] : memref<32x128xf32, #tpu.memory_space<any>> -> memref<1x128xf32, #tpu.memory_space<any>>
    %9 = tpu.memref_squeeze %8 : memref<1x128xf32, #tpu.memory_space<any>> -> memref<128xf32, #tpu.memory_space<any>>
    %c0_i32_11 = arith.constant 0 : i32
    %10 = tpu.memref_slice %arg4[%c0_i32_8, %c0_i32_11] : memref<16x128xf32, #tpu.memory_space<vmem>> -> memref<1x128xf32, #tpu.memory_space<vmem>>
    %11 = tpu.memref_squeeze %10 : memref<1x128xf32, #tpu.memory_space<vmem>> -> memref<128xf32, #tpu.memory_space<vmem>>
    %12 = tpu.memref_slice %arg5[%c1_i32_9] : memref<16x!tpu.dma_semaphore, #tpu.memory_space<semaphore_mem>> -> memref<1x!tpu.dma_semaphore, #tpu.memory_space<semaphore_mem>>
    %13 = tpu.memref_squeeze %12 : memref<1x!tpu.dma_semaphore, #tpu.memory_space<semaphore_mem>> -> memref<!tpu.dma_semaphore, #tpu.memory_space<semaphore_mem>>
    tpu.wait_dma2 semaphore(%13 : memref<!tpu.dma_semaphore, #tpu.memory_space<semaphore_mem>>) src(%9 : memref<128xf32, #tpu.memory_space<any>>) dst(%11 : memref<128xf32, #tpu.memory_space<vmem>>)
    %c0_i32_12 = arith.constant 0 : i32
    %c0_i32_13 = arith.constant 0 : i32
    %c2_i32 = arith.constant 2 : i32
    %c0_i32_14 = arith.constant 0 : i32
    %14 = tpu.memref_slice %arg2[%c0_i32_12, %c0_i32_14] : memref<32x128xf32, #tpu.memory_space<any>> -> memref<1x128xf32, #tpu.memory_space<any>>
    %15 = tpu.memref_squeeze %14 : memref<1x128xf32, #tpu.memory_space<any>> -> memref<128xf32, #tpu.memory_space<any>>
    %c0_i32_15 = arith.constant 0 : i32
    %16 = tpu.memref_slice %arg4[%c0_i32_13, %c0_i32_15] : memref<16x128xf32, #tpu.memory_space<vmem>> -> memref<1x128xf32, #tpu.memory_space<vmem>>
    %17 = tpu.memref_squeeze %16 : memref<1x128xf32, #tpu.memory_space<vmem>> -> memref<128xf32, #tpu.memory_space<vmem>>
    %18 = tpu.memref_slice %arg5[%c2_i32] : memref<16x!tpu.dma_semaphore, #tpu.memory_space<semaphore_mem>> -> memref<1x!tpu.dma_semaphore, #tpu.memory_space<semaphore_mem>>
    %19 = tpu.memref_squeeze %18 : memref<1x!tpu.dma_semaphore, #tpu.memory_space<semaphore_mem>> -> memref<!tpu.dma_semaphore, #tpu.memory_space<semaphore_mem>>
    tpu.wait_dma2 semaphore(%19 : memref<!tpu.dma_semaphore, #tpu.memory_space<semaphore_mem>>) src(%15 : memref<128xf32, #tpu.memory_space<any>>) dst(%17 : memref<128xf32, #tpu.memory_space<vmem>>)
    %c0_i32_16 = arith.constant 0 : i32
    %c0_i32_17 = arith.constant 0 : i32
    %c3_i32 = arith.constant 3 : i32
    %c0_i32_18 = arith.constant 0 : i32
    %20 = tpu.memref_slice %arg2[%c0_i32_16, %c0_i32_18] : memref<32x128xf32, #tpu.memory_space<any>> -> memref<1x128xf32, #tpu.memory_space<any>>
    %21 = tpu.memref_squeeze %20 : memref<1x128xf32, #tpu.memory_space<any>> -> memref<128xf32, #tpu.memory_space<any>>
    %c0_i32_19 = arith.constant 0 : i32
    %22 = tpu.memref_slice %arg4[%c0_i32_17, %c0_i32_19] : memref<16x128xf32, #tpu.memory_space<vmem>> -> memref<1x128xf32, #tpu.memory_space<vmem>>
    %23 = tpu.memref_squeeze %22 : memref<1x128xf32, #tpu.memory_space<vmem>> -> memref<128xf32, #tpu.memory_space<vmem>>
    %24 = tpu.memref_slice %arg5[%c3_i32] : memref<16x!tpu.dma_semaphore, #tpu.memory_space<semaphore_mem>> -> memref<1x!tpu.dma_semaphore, #tpu.memory_space<semaphore_mem>>
    %25 = tpu.memref_squeeze %24 : memref<1x!tpu.dma_semaphore, #tpu.memory_space<semaphore_mem>> -> memref<!tpu.dma_semaphore, #tpu.memory_space<semaphore_mem>>
    tpu.wait_dma2 semaphore(%25 : memref<!tpu.dma_semaphore, #tpu.memory_space<semaphore_mem>>) src(%21 : memref<128xf32, #tpu.memory_space<any>>) dst(%23 : memref<128xf32, #tpu.memory_space<vmem>>)
    %c0_i32_20 = arith.constant 0 : i32
    %c0_i32_21 = arith.constant 0 : i32
    %c4_i32 = arith.constant 4 : i32
    %c0_i32_22 = arith.constant 0 : i32
    %26 = tpu.memref_slice %arg2[%c0_i32_20, %c0_i32_22] : memref<32x128xf32, #tpu.memory_space<any>> -> memref<1x128xf32, #tpu.memory_space<any>>
    %27 = tpu.memref_squeeze %26 : memref<1x128xf32, #tpu.memory_space<any>> -> memref<128xf32, #tpu.memory_space<any>>
    %c0_i32_23 = arith.constant 0 : i32
    %28 = tpu.memref_slice %arg4[%c0_i32_21, %c0_i32_23] : memref<16x128xf32, #tpu.memory_space<vmem>> -> memref<1x128xf32, #tpu.memory_space<vmem>>
    %29 = tpu.memref_squeeze %28 : memref<1x128xf32, #tpu.memory_space<vmem>> -> memref<128xf32, #tpu.memory_space<vmem>>
    %30 = tpu.memref_slice %arg5[%c4_i32] : memref<16x!tpu.dma_semaphore, #tpu.memory_space<semaphore_mem>> -> memref<1x!tpu.dma_semaphore, #tpu.memory_space<semaphore_mem>>
    %31 = tpu.memref_squeeze %30 : memref<1x!tpu.dma_semaphore, #tpu.memory_space<semaphore_mem>> -> memref<!tpu.dma_semaphore, #tpu.memory_space<semaphore_mem>>
    tpu.wait_dma2 semaphore(%31 : memref<!tpu.dma_semaphore, #tpu.memory_space<semaphore_mem>>) src(%27 : memref<128xf32, #tpu.memory_space<any>>) dst(%29 : memref<128xf32, #tpu.memory_space<vmem>>)
    %c0_i32_24 = arith.constant 0 : i32
    %c0_i32_25 = arith.constant 0 : i32
    %c5_i32 = arith.constant 5 : i32
    %c0_i32_26 = arith.constant 0 : i32
    %32 = tpu.memref_slice %arg2[%c0_i32_24, %c0_i32_26] : memref<32x128xf32, #tpu.memory_space<any>> -> memref<1x128xf32, #tpu.memory_space<any>>
    %33 = tpu.memref_squeeze %32 : memref<1x128xf32, #tpu.memory_space<any>> -> memref<128xf32, #tpu.memory_space<any>>
    %c0_i32_27 = arith.constant 0 : i32
    %34 = tpu.memref_slice %arg4[%c0_i32_25, %c0_i32_27] : memref<16x128xf32, #tpu.memory_space<vmem>> -> memref<1x128xf32, #tpu.memory_space<vmem>>
    %35 = tpu.memref_squeeze %34 : memref<1x128xf32, #tpu.memory_space<vmem>> -> memref<128xf32, #tpu.memory_space<vmem>>
    %36 = tpu.memref_slice %arg5[%c5_i32] : memref<16x!tpu.dma_semaphore, #tpu.memory_space<semaphore_mem>> -> memref<1x!tpu.dma_semaphore, #tpu.memory_space<semaphore_mem>>
    %37 = tpu.memref_squeeze %36 : memref<1x!tpu.dma_semaphore, #tpu.memory_space<semaphore_mem>> -> memref<!tpu.dma_semaphore, #tpu.memory_space<semaphore_mem>>
    tpu.wait_dma2 semaphore(%37 : memref<!tpu.dma_semaphore, #tpu.memory_space<semaphore_mem>>) src(%33 : memref<128xf32, #tpu.memory_space<any>>) dst(%35 : memref<128xf32, #tpu.memory_space<vmem>>)
    %c0_i32_28 = arith.constant 0 : i32
    %c0_i32_29 = arith.constant 0 : i32
    %c6_i32 = arith.constant 6 : i32
    %c0_i32_30 = arith.constant 0 : i32
    %38 = tpu.memref_slice %arg2[%c0_i32_28, %c0_i32_30] : memref<32x128xf32, #tpu.memory_space<any>> -> memref<1x128xf32, #tpu.memory_space<any>>
    %39 = tpu.memref_squeeze %38 : memref<1x128xf32, #tpu.memory_space<any>> -> memref<128xf32, #tpu.memory_space<any>>
    %c0_i32_31 = arith.constant 0 : i32
    %40 = tpu.memref_slice %arg4[%c0_i32_29, %c0_i32_31] : memref<16x128xf32, #tpu.memory_space<vmem>> -> memref<1x128xf32, #tpu.memory_space<vmem>>
    %41 = tpu.memref_squeeze %40 : memref<1x128xf32, #tpu.memory_space<vmem>> -> memref<128xf32, #tpu.memory_space<vmem>>
    %42 = tpu.memref_slice %arg5[%c6_i32] : memref<16x!tpu.dma_semaphore, #tpu.memory_space<semaphore_mem>> -> memref<1x!tpu.dma_semaphore, #tpu.memory_space<semaphore_mem>>
    %43 = tpu.memref_squeeze %42 : memref<1x!tpu.dma_semaphore, #tpu.memory_space<semaphore_mem>> -> memref<!tpu.dma_semaphore, #tpu.memory_space<semaphore_mem>>
    tpu.wait_dma2 semaphore(%43 : memref<!tpu.dma_semaphore, #tpu.memory_space<semaphore_mem>>) src(%39 : memref<128xf32, #tpu.memory_space<any>>) dst(%41 : memref<128xf32, #tpu.memory_space<vmem>>)
    %c0_i32_32 = arith.constant 0 : i32
    %c0_i32_33 = arith.constant 0 : i32
    %c7_i32 = arith.constant 7 : i32
    %c0_i32_34 = arith.constant 0 : i32
    %44 = tpu.memref_slice %arg2[%c0_i32_32, %c0_i32_34] : memref<32x128xf32, #tpu.memory_space<any>> -> memref<1x128xf32, #tpu.memory_space<any>>
    %45 = tpu.memref_squeeze %44 : memref<1x128xf32, #tpu.memory_space<any>> -> memref<128xf32, #tpu.memory_space<any>>
    %c0_i32_35 = arith.constant 0 : i32
    %46 = tpu.memref_slice %arg4[%c0_i32_33, %c0_i32_35] : memref<16x128xf32, #tpu.memory_space<vmem>> -> memref<1x128xf32, #tpu.memory_space<vmem>>
    %47 = tpu.memref_squeeze %46 : memref<1x128xf32, #tpu.memory_space<vmem>> -> memref<128xf32, #tpu.memory_space<vmem>>
    %48 = tpu.memref_slice %arg5[%c7_i32] : memref<16x!tpu.dma_semaphore, #tpu.memory_space<semaphore_mem>> -> memref<1x!tpu.dma_semaphore, #tpu.memory_space<semaphore_mem>>
    %49 = tpu.memref_squeeze %48 : memref<1x!tpu.dma_semaphore, #tpu.memory_space<semaphore_mem>> -> memref<!tpu.dma_semaphore, #tpu.memory_space<semaphore_mem>>
    tpu.wait_dma2 semaphore(%49 : memref<!tpu.dma_semaphore, #tpu.memory_space<semaphore_mem>>) src(%45 : memref<128xf32, #tpu.memory_space<any>>) dst(%47 : memref<128xf32, #tpu.memory_space<vmem>>)
    %c0_i32_36 = arith.constant 0 : i32
    %c0_i32_37 = arith.constant 0 : i32
    %c8_i32 = arith.constant 8 : i32
    %c0_i32_38 = arith.constant 0 : i32
    %50 = tpu.memref_slice %arg2[%c0_i32_36, %c0_i32_38] : memref<32x128xf32, #tpu.memory_space<any>> -> memref<1x128xf32, #tpu.memory_space<any>>
    %51 = tpu.memref_squeeze %50 : memref<1x128xf32, #tpu.memory_space<any>> -> memref<128xf32, #tpu.memory_space<any>>
    %c0_i32_39 = arith.constant 0 : i32
    %52 = tpu.memref_slice %arg4[%c0_i32_37, %c0_i32_39] : memref<16x128xf32, #tpu.memory_space<vmem>> -> memref<1x128xf32, #tpu.memory_space<vmem>>
    %53 = tpu.memref_squeeze %52 : memref<1x128xf32, #tpu.memory_space<vmem>> -> memref<128xf32, #tpu.memory_space<vmem>>
    %54 = tpu.memref_slice %arg5[%c8_i32] : memref<16x!tpu.dma_semaphore, #tpu.memory_space<semaphore_mem>> -> memref<1x!tpu.dma_semaphore, #tpu.memory_space<semaphore_mem>>
    %55 = tpu.memref_squeeze %54 : memref<1x!tpu.dma_semaphore, #tpu.memory_space<semaphore_mem>> -> memref<!tpu.dma_semaphore, #tpu.memory_space<semaphore_mem>>
    tpu.wait_dma2 semaphore(%55 : memref<!tpu.dma_semaphore, #tpu.memory_space<semaphore_mem>>) src(%51 : memref<128xf32, #tpu.memory_space<any>>) dst(%53 : memref<128xf32, #tpu.memory_space<vmem>>)
    %c0_i32_40 = arith.constant 0 : i32
    %c0_i32_41 = arith.constant 0 : i32
    %c9_i32 = arith.constant 9 : i32
    %c0_i32_42 = arith.constant 0 : i32
    %56 = tpu.memref_slice %arg2[%c0_i32_40, %c0_i32_42] : memref<32x128xf32, #tpu.memory_space<any>> -> memref<1x128xf32, #tpu.memory_space<any>>
    %57 = tpu.memref_squeeze %56 : memref<1x128xf32, #tpu.memory_space<any>> -> memref<128xf32, #tpu.memory_space<any>>
    %c0_i32_43 = arith.constant 0 : i32
    %58 = tpu.memref_slice %arg4[%c0_i32_41, %c0_i32_43] : memref<16x128xf32, #tpu.memory_space<vmem>> -> memref<1x128xf32, #tpu.memory_space<vmem>>
    %59 = tpu.memref_squeeze %58 : memref<1x128xf32, #tpu.memory_space<vmem>> -> memref<128xf32, #tpu.memory_space<vmem>>
    %60 = tpu.memref_slice %arg5[%c9_i32] : memref<16x!tpu.dma_semaphore, #tpu.memory_space<semaphore_mem>> -> memref<1x!tpu.dma_semaphore, #tpu.memory_space<semaphore_mem>>
    %61 = tpu.memref_squeeze %60 : memref<1x!tpu.dma_semaphore, #tpu.memory_space<semaphore_mem>> -> memref<!tpu.dma_semaphore, #tpu.memory_space<semaphore_mem>>
    tpu.wait_dma2 semaphore(%61 : memref<!tpu.dma_semaphore, #tpu.memory_space<semaphore_mem>>) src(%57 : memref<128xf32, #tpu.memory_space<any>>) dst(%59 : memref<128xf32, #tpu.memory_space<vmem>>)
    %c0_i32_44 = arith.constant 0 : i32
    %c0_i32_45 = arith.constant 0 : i32
    %c10_i32 = arith.constant 10 : i32
    %c0_i32_46 = arith.constant 0 : i32
    %62 = tpu.memref_slice %arg2[%c0_i32_44, %c0_i32_46] : memref<32x128xf32, #tpu.memory_space<any>> -> memref<1x128xf32, #tpu.memory_space<any>>
    %63 = tpu.memref_squeeze %62 : memref<1x128xf32, #tpu.memory_space<any>> -> memref<128xf32, #tpu.memory_space<any>>
    %c0_i32_47 = arith.constant 0 : i32
    %64 = tpu.memref_slice %arg4[%c0_i32_45, %c0_i32_47] : memref<16x128xf32, #tpu.memory_space<vmem>> -> memref<1x128xf32, #tpu.memory_space<vmem>>
    %65 = tpu.memref_squeeze %64 : memref<1x128xf32, #tpu.memory_space<vmem>> -> memref<128xf32, #tpu.memory_space<vmem>>
    %66 = tpu.memref_slice %arg5[%c10_i32] : memref<16x!tpu.dma_semaphore, #tpu.memory_space<semaphore_mem>> -> memref<1x!tpu.dma_semaphore, #tpu.memory_space<semaphore_mem>>
    %67 = tpu.memref_squeeze %66 : memref<1x!tpu.dma_semaphore, #tpu.memory_space<semaphore_mem>> -> memref<!tpu.dma_semaphore, #tpu.memory_space<semaphore_mem>>
    tpu.wait_dma2 semaphore(%67 : memref<!tpu.dma_semaphore, #tpu.memory_space<semaphore_mem>>) src(%63 : memref<128xf32, #tpu.memory_space<any>>) dst(%65 : memref<128xf32, #tpu.memory_space<vmem>>)
    %c0_i32_48 = arith.constant 0 : i32
    %c0_i32_49 = arith.constant 0 : i32
    %c11_i32 = arith.constant 11 : i32
    %c0_i32_50 = arith.constant 0 : i32
    %68 = tpu.memref_slice %arg2[%c0_i32_48, %c0_i32_50] : memref<32x128xf32, #tpu.memory_space<any>> -> memref<1x128xf32, #tpu.memory_space<any>>
    %69 = tpu.memref_squeeze %68 : memref<1x128xf32, #tpu.memory_space<any>> -> memref<128xf32, #tpu.memory_space<any>>
    %c0_i32_51 = arith.constant 0 : i32
    %70 = tpu.memref_slice %arg4[%c0_i32_49, %c0_i32_51] : memref<16x128xf32, #tpu.memory_space<vmem>> -> memref<1x128xf32, #tpu.memory_space<vmem>>
    %71 = tpu.memref_squeeze %70 : memref<1x128xf32, #tpu.memory_space<vmem>> -> memref<128xf32, #tpu.memory_space<vmem>>
    %72 = tpu.memref_slice %arg5[%c11_i32] : memref<16x!tpu.dma_semaphore, #tpu.memory_space<semaphore_mem>> -> memref<1x!tpu.dma_semaphore, #tpu.memory_space<semaphore_mem>>
    %73 = tpu.memref_squeeze %72 : memref<1x!tpu.dma_semaphore, #tpu.memory_space<semaphore_mem>> -> memref<!tpu.dma_semaphore, #tpu.memory_space<semaphore_mem>>
    tpu.wait_dma2 semaphore(%73 : memref<!tpu.dma_semaphore, #tpu.memory_space<semaphore_mem>>) src(%69 : memref<128xf32, #tpu.memory_space<any>>) dst(%71 : memref<128xf32, #tpu.memory_space<vmem>>)
    %c0_i32_52 = arith.constant 0 : i32
    %c0_i32_53 = arith.constant 0 : i32
    %c12_i32 = arith.constant 12 : i32
    %c0_i32_54 = arith.constant 0 : i32
    %74 = tpu.memref_slice %arg2[%c0_i32_52, %c0_i32_54] : memref<32x128xf32, #tpu.memory_space<any>> -> memref<1x128xf32, #tpu.memory_space<any>>
    %75 = tpu.memref_squeeze %74 : memref<1x128xf32, #tpu.memory_space<any>> -> memref<128xf32, #tpu.memory_space<any>>
    %c0_i32_55 = arith.constant 0 : i32
    %76 = tpu.memref_slice %arg4[%c0_i32_53, %c0_i32_55] : memref<16x128xf32, #tpu.memory_space<vmem>> -> memref<1x128xf32, #tpu.memory_space<vmem>>
    %77 = tpu.memref_squeeze %76 : memref<1x128xf32, #tpu.memory_space<vmem>> -> memref<128xf32, #tpu.memory_space<vmem>>
    %78 = tpu.memref_slice %arg5[%c12_i32] : memref<16x!tpu.dma_semaphore, #tpu.memory_space<semaphore_mem>> -> memref<1x!tpu.dma_semaphore, #tpu.memory_space<semaphore_mem>>
    %79 = tpu.memref_squeeze %78 : memref<1x!tpu.dma_semaphore, #tpu.memory_space<semaphore_mem>> -> memref<!tpu.dma_semaphore, #tpu.memory_space<semaphore_mem>>
    tpu.wait_dma2 semaphore(%79 : memref<!tpu.dma_semaphore, #tpu.memory_space<semaphore_mem>>) src(%75 : memref<128xf32, #tpu.memory_space<any>>) dst(%77 : memref<128xf32, #tpu.memory_space<vmem>>)
    %c0_i32_56 = arith.constant 0 : i32
    %c0_i32_57 = arith.constant 0 : i32
    %c13_i32 = arith.constant 13 : i32
    %c0_i32_58 = arith.constant 0 : i32
    %80 = tpu.memref_slice %arg2[%c0_i32_56, %c0_i32_58] : memref<32x128xf32, #tpu.memory_space<any>> -> memref<1x128xf32, #tpu.memory_space<any>>
    %81 = tpu.memref_squeeze %80 : memref<1x128xf32, #tpu.memory_space<any>> -> memref<128xf32, #tpu.memory_space<any>>
    %c0_i32_59 = arith.constant 0 : i32
    %82 = tpu.memref_slice %arg4[%c0_i32_57, %c0_i32_59] : memref<16x128xf32, #tpu.memory_space<vmem>> -> memref<1x128xf32, #tpu.memory_space<vmem>>
    %83 = tpu.memref_squeeze %82 : memref<1x128xf32, #tpu.memory_space<vmem>> -> memref<128xf32, #tpu.memory_space<vmem>>
    %84 = tpu.memref_slice %arg5[%c13_i32] : memref<16x!tpu.dma_semaphore, #tpu.memory_space<semaphore_mem>> -> memref<1x!tpu.dma_semaphore, #tpu.memory_space<semaphore_mem>>
    %85 = tpu.memref_squeeze %84 : memref<1x!tpu.dma_semaphore, #tpu.memory_space<semaphore_mem>> -> memref<!tpu.dma_semaphore, #tpu.memory_space<semaphore_mem>>
    tpu.wait_dma2 semaphore(%85 : memref<!tpu.dma_semaphore, #tpu.memory_space<semaphore_mem>>) src(%81 : memref<128xf32, #tpu.memory_space<any>>) dst(%83 : memref<128xf32, #tpu.memory_space<vmem>>)
    %c0_i32_60 = arith.constant 0 : i32
    %c0_i32_61 = arith.constant 0 : i32
    %c14_i32 = arith.constant 14 : i32
    %c0_i32_62 = arith.constant 0 : i32
    %86 = tpu.memref_slice %arg2[%c0_i32_60, %c0_i32_62] : memref<32x128xf32, #tpu.memory_space<any>> -> memref<1x128xf32, #tpu.memory_space<any>>
    %87 = tpu.memref_squeeze %86 : memref<1x128xf32, #tpu.memory_space<any>> -> memref<128xf32, #tpu.memory_space<any>>
    %c0_i32_63 = arith.constant 0 : i32
    %88 = tpu.memref_slice %arg4[%c0_i32_61, %c0_i32_63] : memref<16x128xf32, #tpu.memory_space<vmem>> -> memref<1x128xf32, #tpu.memory_space<vmem>>
    %89 = tpu.memref_squeeze %88 : memref<1x128xf32, #tpu.memory_space<vmem>> -> memref<128xf32, #tpu.memory_space<vmem>>
    %90 = tpu.memref_slice %arg5[%c14_i32] : memref<16x!tpu.dma_semaphore, #tpu.memory_space<semaphore_mem>> -> memref<1x!tpu.dma_semaphore, #tpu.memory_space<semaphore_mem>>
    %91 = tpu.memref_squeeze %90 : memref<1x!tpu.dma_semaphore, #tpu.memory_space<semaphore_mem>> -> memref<!tpu.dma_semaphore, #tpu.memory_space<semaphore_mem>>
    tpu.wait_dma2 semaphore(%91 : memref<!tpu.dma_semaphore, #tpu.memory_space<semaphore_mem>>) src(%87 : memref<128xf32, #tpu.memory_space<any>>) dst(%89 : memref<128xf32, #tpu.memory_space<vmem>>)
    %c0_i32_64 = arith.constant 0 : i32
    %c0_i32_65 = arith.constant 0 : i32
    %c15_i32 = arith.constant 15 : i32
    %c0_i32_66 = arith.constant 0 : i32
    %92 = tpu.memref_slice %arg2[%c0_i32_64, %c0_i32_66] : memref<32x128xf32, #tpu.memory_space<any>> -> memref<1x128xf32, #tpu.memory_space<any>>
    %93 = tpu.memref_squeeze %92 : memref<1x128xf32, #tpu.memory_space<any>> -> memref<128xf32, #tpu.memory_space<any>>
    %c0_i32_67 = arith.constant 0 : i32
    %94 = tpu.memref_slice %arg4[%c0_i32_65, %c0_i32_67] : memref<16x128xf32, #tpu.memory_space<vmem>> -> memref<1x128xf32, #tpu.memory_space<vmem>>
    %95 = tpu.memref_squeeze %94 : memref<1x128xf32, #tpu.memory_space<vmem>> -> memref<128xf32, #tpu.memory_space<vmem>>
    %96 = tpu.memref_slice %arg5[%c15_i32] : memref<16x!tpu.dma_semaphore, #tpu.memory_space<semaphore_mem>> -> memref<1x!tpu.dma_semaphore, #tpu.memory_space<semaphore_mem>>
    %97 = tpu.memref_squeeze %96 : memref<1x!tpu.dma_semaphore, #tpu.memory_space<semaphore_mem>> -> memref<!tpu.dma_semaphore, #tpu.memory_space<semaphore_mem>>
    tpu.wait_dma2 semaphore(%97 : memref<!tpu.dma_semaphore, #tpu.memory_space<semaphore_mem>>) src(%93 : memref<128xf32, #tpu.memory_space<any>>) dst(%95 : memref<128xf32, #tpu.memory_space<vmem>>)
    %c0 = arith.constant 0 : index
    %c0_68 = arith.constant 0 : index
    %98 = vector.load %arg4[%c0, %c0_68] : memref<16x128xf32, #tpu.memory_space<vmem>>, vector<16x128xf32>
    %c0_69 = arith.constant 0 : index
    %c0_70 = arith.constant 0 : index
    %99 = vector.load %arg3[%c0_69, %c0_70] : memref<16x128xf32, #tpu.memory_space<vmem>>, vector<16x128xf32>
    tpu.vector_store %arg3[%c0_69, %c0_70], %98 {strides = array<i32>} : memref<16x128xf32, #tpu.memory_space<vmem>>, vector<16x128xf32>,
    return
  }
  func.func @transform_1(%arg0: i32, %arg1: memref<16xi32, #tpu.memory_space<smem>>) -> (i32, i32) {
    %c0_i32 = arith.constant 0 : i32
    %c0_i32_0 = arith.constant 0 : i32
    return %arg0, %c0_i32 : i32, i32
  }
}

</mosaic_0001>

<bundles_post_ra>
// kernel: embedder_forward.1
= control target key start
LH: loop header
LB: loop body
LE: loop exit
PB: predicated region body
PF: predicated region fallthrough
CT: control target
= control target key end

     0   :  { %s391_s0 = inlined_call_operand.vmem [shape: s32[16], index: 0, kind: input, shape index: {}]   ;;  %s392_s1 = inlined_call_operand.vmem [shape: f32[32,128], index: 1, kind: input, shape index: {}]   ;;  %s393_s2 = inlined_call_operand.vmem [shape: f32[16,128], index: 2, kind: output, shape index: {}]  }
   0x1   :  { %s7_s11 = sshll.u32 %s391_s0, 4  ;;  %s8_s11 = int_to_ptr.vmem [resolvable:$true] %s7_s11 }
   0x2   :  { %s305_s12 = scalar_lea.vmem %s8_s11, 16  ;;  %p310_p1 = scmp.lt.s32.totalorder %s8_s11, %s8_s11 }
   0x3   :  { %p306_p0 = scmp.ne.s32.totalorder %s8_s11, %s305_s12  ;;  %p311_p2 = scmp.lt.s32.totalorder %s305_s12, %s305_s12 }
   0x5   :  { %p312_p3 = por %p311_p2, %p310_p1 }
   0x7   :  { %p313_p4 = pnand %p312_p3, %p306_p0 }
   0x9   :  { %316 = shalt.err (!%p313_p4)  }
   0xa   :  { %s363_s13 = smov [#allocation5]  }
   0xb   :  { %10 = dma.vmem_to_smem %s8_s11, 16, %s363_s13, [#allocation4] }
   0xc   :  { %321 = dma.done.wait [#allocation4], 16 }
   0xd   :  { %322 = vsyncadd [#allocation4], 4294967280 }
   0xe   :  { %12 = sfence }
   0xf   :  { %s359_s14 = smov 0  }
  0x10 LB: > { %p20_p5 = scmp.lt.s32.totalorder %s361_s14, 0  ;;  %s21_s15 = ssub.s32 0, %s361_s14  ;;  %s361_s14 = sphi %s359_s14, %s19_s14  }
  0x11   : > { %s273_s0 = smin.u32 %s361_s14, %s21_s15  ;;  %p295_p6 = scmp.ge.s32.totalorder %s361_s14, 16 }
  0x12   : > { %s23_s16 = sand.u32 15, %s273_s0  }
  0x13   : > { %s24_s17 = ssub.s32 0, %s23_s16 }
  0x14   : > { %s395_s17 = smov (!%p20_p5, %s24_s17), %s23_s16 }
  0x15   : > { %p275_p7 = scmp.lt.s32.totalorder %s395_s17, 0  ;;  %s30_s18 = sadd.s32 16, %s395_s17 }
  0x17   : > { %s397_s18 = smov (!%p275_p7, %s30_s18), %s395_s17 }
  0x18   : > { %s36_s19 = scalar_lea.sflag [#allocation3], %s397_s18 }
  0x19   : > { %324 = dma.done.wait (%p295_p6), %s36_s19, 16 }
  0x1a   : > { %326 = vsyncadd (%p295_p6), %s36_s19, 4294967280  ;;  %s40_s20 = sld [smem:[#allocation5 + %s361_s14]]  ;;  %s42_s24 = scalar_lea.vmem [#allocation2], %s361_s14 }
  0x20   : > { %s41_s23 = scalar_lea.vmem %s392_s1, %s40_s20 }
  0x21   : > { %v61_v0 = vld [vmem:[%s41_s23] sm:$0x1] }
  0x22   : > { %62 = vst [vmem:[%s42_s24] sm:$0x1] %v61_v0 }
  0x23   : > { %87 = vsyncadd %s36_s19, 16  ;;  %s19_s14 = sadd.s32 1, %s361_s14  }
  0x24   : > { %p16_p8 = scmp.ge.s32.totalorder %s19_s14, 16  }
  0x26   :  { %18 = sbr.rel (!%p16_p8) target bundleno = 16 (0x10), region = 105 }
  0x2d   :  { %327 = dma.done.wait [#allocation3], 16 }
  0x2e   :  { %328 = vsyncadd [#allocation3], 4294967280 }
  0x2f   :  { %329 = dma.done.wait [#allocation3 + $0x1], 16 }
  0x30   :  { %330 = vsyncadd [#allocation3 + $0x1], 4294967280 }
  0x31   :  { %331 = dma.done.wait [#allocation3 + $0x2], 16 }
  0x32   :  { %332 = vsyncadd [#allocation3 + $0x2], 4294967280 }
  0x33   :  { %333 = dma.done.wait [#allocation3 + $0x3], 16 }
  0x34   :  { %334 = vsyncadd [#allocation3 + $0x3], 4294967280 }
  0x35   :  { %335 = dma.done.wait [#allocation3 + $0x4], 16 }
  0x36   :  { %336 = vsyncadd [#allocation3 + $0x4], 4294967280 }
  0x37   :  { %337 = dma.done.wait [#allocation3 + $0x5], 16 }
  0x38   :  { %338 = vsyncadd [#allocation3 + $0x5], 4294967280 }
  0x39   :  { %339 = dma.done.wait [#allocation3 + $0x6], 16 }
  0x3a   :  { %340 = vsyncadd [#allocation3 + $0x6], 4294967280 }
  0x3b   :  { %341 = dma.done.wait [#allocation3 + $0x7], 16 }
  0x3c   :  { %342 = vsyncadd [#allocation3 + $0x7], 4294967280 }
  0x3d   :  { %343 = dma.done.wait [#allocation3 + $0x8], 16 }
  0x3e   :  { %344 = vsyncadd [#allocation3 + $0x8], 4294967280 }
  0x3f   :  { %345 = dma.done.wait [#allocation3 + $0x9], 16 }
  0x40   :  { %346 = vsyncadd [#allocation3 + $0x9], 4294967280 }
  0x41   :  { %347 = dma.done.wait [#allocation3 + $0xa], 16 }
  0x42   :  { %348 = vsyncadd [#allocation3 + $0xa], 4294967280 }
  0x43   :  { %349 = dma.done.wait [#allocation3 + $0xb], 16 }
  0x44   :  { %350 = vsyncadd [#allocation3 + $0xb], 4294967280 }
  0x45   :  { %351 = dma.done.wait [#allocation3 + $0xc], 16 }
  0x46   :  { %352 = vsyncadd [#allocation3 + $0xc], 4294967280 }
  0x47   :  { %353 = dma.done.wait [#allocation3 + $0xd], 16 }
  0x48   :  { %354 = vsyncadd [#allocation3 + $0xd], 4294967280 }
  0x49   :  { %355 = dma.done.wait [#allocation3 + $0xe], 16 }
  0x4a   :  { %356 = vsyncadd [#allocation3 + $0xe], 4294967280 }
  0x4b   :  { %357 = dma.done.wait [#allocation3 + $0xf], 16 }
  0x4c   :  { %358 = vsyncadd [#allocation3 + $0xf], 4294967280  ;;  %v135_v1 = vld [vmem:[#allocation2] sm:$0xff]  ;;  %v136_v2 = vld [vmem:[#allocation2 + $0x8] sm:$0xff] }
  0x4d   :  { %137 = vst [vmem:[%s393_s2] sm:$0xff] %v135_v1  ;;  %138 = vst [vmem:[%s393_s2 + $0x8] sm:$0xff] %v136_v2 }
  0x4e   :  { %143 = vsyncmov [#allocation3] }
  0x51   :  { %s144_s28 = vpop.sfrf %143 }
  0x52   :  { %p277_p9 = scmp.ne.s32.totalorder %s144_s28, 0 }
  0x54   :  { %148 = shalt.err (%p277_p9)  }
  0x55   :  { %150 = vsyncmov [#allocation3 + $0x1] }
  0x58   :  { %s151_s29 = vpop.sfrf %150 }
  0x59   :  { %p278_p10 = scmp.ne.s32.totalorder %s151_s29, 0 }
  0x5b   :  { %155 = shalt.err (%p278_p10)  }
  0x5c   :  { %157 = vsyncmov [#allocation3 + $0x2] }
  0x5f   :  { %s158_s30 = vpop.sfrf %157 }
  0x60   :  { %p279_p11 = scmp.ne.s32.totalorder %s158_s30, 0 }
  0x62   :  { %162 = shalt.err (%p279_p11)  }
  0x63   :  { %164 = vsyncmov [#allocation3 + $0x3] }
  0x66   :  { %s165_s3 = vpop.sfrf %164 }
  0x67   :  { %p280_p12 = scmp.ne.s32.totalorder %s165_s3, 0 }
  0x69   :  { %169 = shalt.err (%p280_p12)  }
  0x6a   :  { %171 = vsyncmov [#allocation3 + $0x4] }
  0x6d   :  { %s172_s4 = vpop.sfrf %171 }
  0x6e   :  { %p281_p13 = scmp.ne.s32.totalorder %s172_s4, 0 }
  0x70   :  { %176 = shalt.err (%p281_p13)  }
  0x71   :  { %178 = vsyncmov [#allocation3 + $0x5] }
  0x74   :  { %s179_s2 = vpop.sfrf %178 }
  0x75   :  { %p282_p0 = scmp.ne.s32.totalorder %s179_s2, 0 }
  0x77   :  { %183 = shalt.err (%p282_p0)  }
  0x78   :  { %185 = vsyncmov [#allocation3 + $0x6] }
  0x7b   :  { %s186_s5 = vpop.sfrf %185 }
  0x7c   :  { %p283_p1 = scmp.ne.s32.totalorder %s186_s5, 0 }
  0x7e   :  { %190 = shalt.err (%p283_p1)  }
  0x7f   :  { %192 = vsyncmov [#allocation3 + $0x7] }
  0x82   :  { %s193_s6 = vpop.sfrf %192 }
  0x83   :  { %p284_p2 = scmp.ne.s32.totalorder %s193_s6, 0 }
  0x85   :  { %197 = shalt.err (%p284_p2)  }
  0x86   :  { %199 = vsyncmov [#allocation3 + $0x8] }
  0x89   :  { %s200_s7 = vpop.sfrf %199 }
  0x8a   :  { %p285_p3 = scmp.ne.s32.totalorder %s200_s7, 0 }
  0x8c   :  { %204 = shalt.err (%p285_p3)  }
  0x8d   :  { %206 = vsyncmov [#allocation3 + $0x9] }
  0x90   :  { %s207_s8 = vpop.sfrf %206 }
  0x91   :  { %p286_p4 = scmp.ne.s32.totalorder %s207_s8, 0 }
  0x93   :  { %211 = shalt.err (%p286_p4)  }
  0x94   :  { %213 = vsyncmov [#allocation3 + $0xa] }
  0x97   :  { %s214_s9 = vpop.sfrf %213 }
  0x98   :  { %p287_p5 = scmp.ne.s32.totalorder %s214_s9, 0 }
  0x9a   :  { %218 = shalt.err (%p287_p5)  }
  0x9b   :  { %220 = vsyncmov [#allocation3 + $0xb] }
  0x9e   :  { %s221_s10 = vpop.sfrf %220 }
  0x9f   :  { %p288_p6 = scmp.ne.s32.totalorder %s221_s10, 0 }
  0xa1   :  { %225 = shalt.err (%p288_p6)  }
  0xa2   :  { %227 = vsyncmov [#allocation3 + $0xc] }
  0xa5   :  { %s228_s11 = vpop.sfrf %227 }
  0xa6   :  { %p289_p7 = scmp.ne.s32.totalorder %s228_s11, 0 }
  0xa8   :  { %232 = shalt.err (%p289_p7)  }
  0xa9   :  { %234 = vsyncmov [#allocation3 + $0xd] }
  0xac   :  { %s235_s12 = vpop.sfrf %234 }
  0xad   :  { %p290_p8 = scmp.ne.s32.totalorder %s235_s12, 0 }
  0xaf   :  { %239 = shalt.err (%p290_p8)  }
  0xb0   :  { %241 = vsyncmov [#allocation3 + $0xe] }
  0xb3   :  { %s242_s13 = vpop.sfrf %241 }
  0xb4   :  { %p291_p9 = scmp.ne.s32.totalorder %s242_s13, 0 }
  0xb6   :  { %246 = shalt.err (%p291_p9)  }
  0xb7   :  { %248 = vsyncmov [#allocation3 + $0xf] }
  0xba   :  { %s249_s14 = vpop.sfrf %248 }
  0xbb   :  { %p292_p10 = scmp.ne.s32.totalorder %s249_s14, 0 }
  0xbd   :  { %253 = shalt.err (%p292_p10)  }

</bundles_post_ra>
